<compile_context>
chip_gen: v6e
topology: v6e:2x2x1
jax: 0.10.0
libtpu: 0.0.40
codegen_flags: <defaults>
</compile_context>

<pallas_src>
import numpy as np
import jax
import jax.numpy as jnp
from jax.experimental import pallas as pl
from jax.experimental.pallas import tpu as pltpu


def _round_up(x: int, m: int) -> int:
    return ((x + m - 1) // m) * m


def _ifft_matmul_kernel(x_ref, w_ref, o_ref):
    # One MXU matmul per (M, N) tile: (tile_m, 2*fft_bins) @ (2*fft_bins, tile_n).
    o_ref[...] = jnp.dot(
        x_ref[...], w_ref[...], preferred_element_type=jnp.float32
    ).astype(o_ref.dtype)


def make_one_sided_complex_ifft(fft_len: int, tile_m: int = 512,
                                weight_dtype=jnp.float32):
    """Returns forward(x) computing the OneSidedComplexIFFT of the module."""
    assert fft_len >= 2
    assert tile_m % 8 == 0, "tile_m must be a multiple of 8 (sublane tiling)"
    fft_bins = fft_len // 2 + 1
    k2 = 2 * fft_bins
    itemsize = int(jnp.dtype(weight_dtype).itemsize)

    # --- Folded IDFT weight: mirror + de-interleave baked in -----------------
    k = np.arange(fft_bins, dtype=np.float64).reshape(-1, 1)   # (fft_bins, 1)
    n = np.arange(fft_len, dtype=np.float64).reshape(1, -1)    # (1, fft_len)
    ang = 2.0 * np.pi * k * n / fft_len
    scale = np.full((fft_bins, 1), 2.0, dtype=np.float64)
    scale[0, 0] = 1.0                       # DC counted once
    if fft_len % 2 == 0:
        scale[-1, 0] = 1.0                  # Nyquist counted once (even N)
    w_np = np.empty((k2, fft_len), dtype=np.float32)
    w_np[0::2, :] = (scale * np.cos(ang) / fft_len).astype(np.float32)
    w_np[1::2, :] = (-scale * np.sin(ang) / fft_len).astype(np.float32)

    # --- N (lane) tiling: resident weight when small, 512-wide blocks when big.
    full_w_bytes = k2 * fft_len * itemsize
    if fft_len > 512 and full_w_bytes > (6 << 20):
        tile_n = 512
        n_pad = _round_up(fft_len, tile_n)
    else:
        tile_n = fft_len
        n_pad = fft_len
    if n_pad != fft_len:
        w_np = np.pad(w_np, ((0, 0), (0, n_pad - fft_len)))
    w_mat = jnp.asarray(w_np, dtype=weight_dtype)
    w_blk_bytes = k2 * tile_n * itemsize
    # TODO(synk): for very large fft_len the contraction dim (~fft_len) should
    # also be K-tiled with a VMEM accumulator + pl.when init/finalize.

    def _vmem_estimate(tm: int) -> int:
        return (2 * tm * k2 * itemsize        # double-buffered input tiles
                + 2 * w_blk_bytes             # weight block (conservative 2x)
                + 2 * tm * tile_n * 4         # double-buffered output tiles
                + (2 << 20))                  # margin

    def forward(x):
        assert x.ndim == 3 and x.shape[2] == k2, (
            "Input must be (batch, n_frames, fft_bins*2)")
        batch, n_frames, _ = x.shape
        m = batch * n_frames

        x_flat = jnp.reshape(x, (m, k2)).astype(weight_dtype)

        # Largest M tile that keeps the working set within a 48 MiB budget.
        tm = min(tile_m, _round_up(m, 8))
        while _vmem_estimate(tm) > (48 << 20) and tm > 8:
            tm = max(8, ((tm // 2) + 7) // 8 * 8)
        m_pad = _round_up(m, tm)
        if m_pad != m:
            x_flat = jnp.pad(x_flat, ((0, m_pad - m), (0, 0)))

        grid = (m_pad // tm, n_pad // tile_n)

        # Advisory cost for XLA's scheduler around the custom call.
        cost = pl.CostEstimate(
            flops=2 * m_pad * k2 * n_pad,
            transcendentals=0,
            bytes_accessed=(m_pad * k2 * itemsize
                            + (m_pad // tm) * k2 * n_pad * itemsize
                            + m_pad * n_pad * 4),
        )

        cp_kwargs = dict(dimension_semantics=("parallel", "parallel"))
        vneed = _vmem_estimate(tm)
        if vneed > (12 << 20):
            cp_kwargs["vmem_limit_bytes"] = int(min(vneed, 64 << 20))

        out = pl.pallas_call(
            _ifft_matmul_kernel,
            out_shape=jax.ShapeDtypeStruct((m_pad, n_pad), jnp.float32),
            grid_spec=pltpu.PrefetchScalarGridSpec(
                num_scalar_prefetch=0,
                grid=grid,
                in_specs=[
                    pl.BlockSpec((tm, k2), lambda i, j: (i, 0)),
                    # Constant M-index -> weight block stays resident across M.
                    pl.BlockSpec((k2, tile_n), lambda i, j: (0, j)),
                ],
                out_specs=pl.BlockSpec((tm, tile_n), lambda i, j: (i, j)),
            ),
            compiler_params=pltpu.CompilerParams(**cp_kwargs),
            cost_estimate=cost,
        )(x_flat, w_mat)

        if m_pad != m or n_pad != fft_len:
            out = out[:m, :fft_len]
        return out.reshape(batch, n_frames, fft_len)

    return jax.jit(forward)


if __name__ == "__main__":
    # --- Primary check: even fft_len (demo shapes from the module spec) -----
    fft_len = 16
    fft_bins = fft_len // 2 + 1  # 9
    batch, n_frames = 2, 8

    key = jax.random.PRNGKey(0)
    x = jax.random.normal(key, (batch, n_frames, fft_bins * 2), dtype=jnp.float32)

    ifft = make_one_sided_complex_ifft(fft_len)
    out = jax.block_until_ready(ifft(x))
    assert out.shape == (batch, n_frames, fft_len)

    xr = np.asarray(x, dtype=np.float64).reshape(batch * n_frames, fft_bins, 2)
    spec = xr[..., 0] + 1j * xr[..., 1]
    ref = np.fft.irfft(spec, n=fft_len, axis=-1).reshape(batch, n_frames, fft_len)
    np.testing.assert_allclose(np.asarray(out), ref, atol=2e-5, rtol=2e-5)

    # --- Secondary check: odd fft_len + M not a multiple of the tile --------
    fft_len2 = 33
    fft_bins2 = fft_len2 // 2 + 1  # 17
    b2, f2 = 3, 5                  # M = 15 -> padded to 16 rows
    x2 = jax.random.normal(jax.random.PRNGKey(1),
                           (b2, f2, fft_bins2 * 2), dtype=jnp.float32)
    ifft2 = make_one_sided_complex_ifft(fft_len2)
    out2 = jax.block_until_ready(ifft2(x2))
    assert out2.shape == (b2, f2, fft_len2)

    xr2 = np.asarray(x2, dtype=np.float64).reshape(b2 * f2, fft_bins2, 2)
    spec2 = xr2[..., 0] + 1j * xr2[..., 1]
    ref2 = np.fft.irfft(spec2, n=fft_len2, axis=-1).reshape(b2, f2, fft_len2)
    np.testing.assert_allclose(np.asarray(out2), ref2, atol=2e-5, rtol=2e-5)

    print("KERNEL_OK")
</pallas_src>

<mosaic_0001>
module attributes {stable_mosaic.version = 11 : i64} {
  func.func @_ifft_matmul_kernel(%arg0: i32, %arg1: i32, %arg2: memref<16x18xf32, #tpu.memory_space<vmem>>, %arg3: memref<18x16xf32, #tpu.memory_space<vmem>>, %arg4: memref<16x16xf32, #tpu.memory_space<vmem>>) attributes {dimension_semantics = [#tpu.dimension_semantics<parallel>, #tpu.dimension_semantics<parallel>], iteration_bounds = array<i64: 1, 1>, scalar_prefetch = 0 : i64, scratch_operands = 0 : i64, tpu.core_type = #tpu.core_type<tc>, window_params = [{transform_indices = @transform_0, window_bounds = array<i64: 16, 18>}, {transform_indices = @transform_1, window_bounds = array<i64: 18, 16>}, {transform_indices = @transform_2, window_bounds = array<i64: 16, 16>}]} {
    %c0 = arith.constant 0 : index
    %c0_0 = arith.constant 0 : index
    %0 = vector.load %arg2[%c0, %c0_0] : memref<16x18xf32, #tpu.memory_space<vmem>>, vector<16x18xf32>
    %c0_1 = arith.constant 0 : index
    %c0_2 = arith.constant 0 : index
    %1 = vector.load %arg3[%c0_1, %c0_2] : memref<18x16xf32, #tpu.memory_space<vmem>>, vector<18x16xf32>
    %cst = arith.constant dense<0.000000e+00> : vector<16x16xf32>
    %2 = tpu.matmul %0, %1, %cst {dimension_numbers = #tpu.dot_dimension_numbers<[1], [0], [0], [1], [0, 0, 1, 1], [], []>} : vector<16x18xf32>, vector<18x16xf32>, vector<16x16xf32> -> vector<16x16xf32>
    %c0_3 = arith.constant 0 : index
    %c0_4 = arith.constant 0 : index
    %3 = vector.load %arg4[%c0_3, %c0_4] : memref<16x16xf32, #tpu.memory_space<vmem>>, vector<16x16xf32>
    tpu.vector_store %arg4[%c0_3, %c0_4], %2 {strides = array<i32>} : memref<16x16xf32, #tpu.memory_space<vmem>>, vector<16x16xf32>,
    return
  }
  func.func @transform_0(%arg0: i32, %arg1: i32) -> (i32, i32) {
    %c0_i32 = arith.constant 0 : i32
    %c0_i32_0 = arith.constant 0 : i32
    return %arg0, %c0_i32 : i32, i32
  }
  func.func @transform_1(%arg0: i32, %arg1: i32) -> (i32, i32) {
    %c0_i32 = arith.constant 0 : i32
    %c0_i32_0 = arith.constant 0 : i32
    return %c0_i32, %arg1 : i32, i32
  }
  func.func @transform_2(%arg0: i32, %arg1: i32) -> (i32, i32) {
    %c0_i32 = arith.constant 0 : i32
    return %arg0, %arg1 : i32, i32
  }
}

</mosaic_0001>

<bundles_post_ra>
// kernel: forward.1
= control target key start
LH: loop header
LB: loop body
LE: loop exit
PB: predicated region body
PF: predicated region fallthrough
CT: control target
= control target key end

     0   :  { %7 = vsyncpa [#allocation3], 0  ;;  %s278_s0 = inlined_call_operand.hbm [shape: f32[16,18], index: 0, kind: input, shape index: {}]   ;;  %s279_s1 = inlined_call_operand.hbm [shape: f32[18,16], index: 1, kind: input, shape index: {}]   ;;  %s280_s2 = inlined_call_operand.hbm [shape: f32[16,16], index: 2, kind: output, shape index: {}]  }
   0x1   :  { %8 = vsyncpa [#allocation6], 0 }
   0x2   :  { %9 = vsyncpa [#allocation4], 0  ;;  %s240_s9 = smov [#allocation2]  }
   0x3   :  { %s15_s10 = sshll.u32 %s240_s9, 4  ;;  %s16_s10 = int_to_ptr.vmem [resolvable:$true] %s15_s10 }
   0x4   :  { %s182_s11 = scalar_lea.vmem %s16_s10, 256  ;;  %p187_p1 = scmp.lt.s32.totalorder %s16_s10, %s16_s10 }
   0x5   :  { %p183_p0 = scmp.ne.s32.totalorder %s16_s10, %s182_s11  ;;  %p188_p2 = scmp.lt.s32.totalorder %s182_s11, %s182_s11 }
   0x7   :  { %p189_p3 = por %p188_p2, %p187_p1 }
   0x9   :  { %p190_p4 = pnand %p189_p3, %p183_p0 }
   0xb   :  { %193 = shalt.err (!%p190_p4)
}
   0xc   :  { %s241_s12 = smov 128   ;;  %s242_s13 = smov 8  }
   0xd   :  { %21 = dma.hbm_to_vmem [thread:$0]  %s278_s0, 256, %s16_s10, [#allocation3], %s241_s12, %s241_s12, %s242_s13  }
   0xe   :  { %s243_s16 = smov [#allocation5]  }
   0xf   :  { %s27_s17 = sshll.u32 %s243_s16, 4  ;;  %s28_s17 = int_to_ptr.vmem [resolvable:$true] %s27_s17 }
  0x10   :  { %s202_s18 = scalar_lea.vmem %s28_s17, 384  ;;  %p207_p6 = scmp.lt.s32.totalorder %s28_s17, %s28_s17 }
  0x11   :  { %p203_p5 = scmp.ne.s32.totalorder %s28_s17, %s202_s18  ;;  %p208_p7 = scmp.lt.s32.totalorder %s202_s18, %s202_s18 }
  0x13   :  { %p209_p8 = por %p208_p7, %p207_p6 }
  0x15   :  { %p210_p9 = pnand %p209_p8, %p203_p5 }
  0x17   :  { %213 = shalt.err (!%p210_p9)
}
  0x18   :  { %33 = dma.hbm_to_vmem [thread:$0]  %s279_s1, 384, %s28_s17, [#allocation6], %s241_s12, %s241_s12, %s242_s13  }
  0x19   :  { %234 = dma.done.wait [#allocation3], 256  }
  0x1a   :  { %235 = vsyncadd [#allocation3], 4294967040 }
  0x1b   :  { %236 = dma.done.wait [#allocation6], 384  }
  0x1c   :  { %237 = vsyncadd [#allocation6], 4294966912  ;;  %vm52_vm0 = vcmask 1041408   ;;  %vm45_vm1 = vcmask 146432   ;;  %v44_v0 = vld [vmem:[#allocation5 + $0x10] sm:$0x3] }
  0x1d   :  { %v43_v1 = vld [vmem:[#allocation5 + $0x8] sm:$0xff]  ;;  %160 = vmatprep.subr.msk.mxu0 %vm52_vm0, %v44_v0  ;;  %v40_v2 = vld [vmem:[#allocation2] sm:$0xff]  ;;  %v42_v3 = vld [vmem:[#allocation5] sm:$0xff]  ;;  %vm131_vm2 = vcmask 130048   ;;  %s244_s0 = smov [#allocation7]  }
  0x1e   :  { %161 = vmatpush3.msk.msra.mxu0 %vm52_vm0, %v44_v0  ;;  %166 = vmatprep.mubr.msk.f32.mxu0 %vm45_vm1, %v40_v2  ;;  %v41_v4 = vld [vmem:[#allocation2 + $0x8] sm:$0xff]  ;;  %s139_s1 = sshll.u32 %s244_s0, 4  ;;  %s140_s1 = int_to_ptr.vmem [resolvable:$true] %s139_s1 }
  0x1f   :  { %162 = vmatprep.subr.mxu0 %v43_v1  ;;  %s214_s21 = scalar_lea.vmem %s140_s1, 256  ;;  %p219_p11 = scmp.lt.s32.totalorder %s140_s1, %s140_s1 }
  0x20   :  { %163 = vmatpush3.msra.mxu0 %v43_v1  ;;  %p215_p10 = scmp.ne.s32.totalorder %s140_s1, %s214_s21  ;;  %p220_p12 = scmp.lt.s32.totalorder %s214_s21, %s214_s21 }
  0x21   :  { %164 = vmatprep.subr.mxu0 %v42_v3 }
  0x22   :  { %165 = vmatpush3.msra.mxu0 %v42_v3  ;;  %p221_p13 = por %p220_p12, %p219_p11 }
  0x23   :  { %167 = vmatmul.mubr.msk.f32.vlgmr.msra.gmra.mxu0 %vm45_vm1, %v41_v4 }
  0x24   :  { %p222_p0 = pnand %p221_p13, %p215_p10 }
  0xe3   :  { %v168_v5 = vpop.f32.mrf.mxu0 }
  0xe4   :  { %133 = vst.msk [vmem:[#allocation7 + $0x8] sm:$0xff] %vm131_vm2, %v168_v5 }
  0xe5   :  { %v122_v6 = vpop.f32.mrf.mxu0 }
  0xe6   :  { %132 = vst.msk [vmem:[#allocation7] sm:$0xff] %vm131_vm2, %v122_v6 }
  0xe7   :  { %225 = shalt.err (!%p222_p0)
}
  0xe8   :  { %145 = dma.vmem_to_hbm [thread:$0]  %s140_s1, 256, %s280_s2, [#allocation4], %s241_s12, %s241_s12, %s242_s13  }
  0xe9   :  { %238 = dma.done.wait [#allocation4], 256  }
  0xea   :  { %239 = vsyncadd [#allocation4], 4294967040 }
  0xeb   :  { %149 = vsyncpa [#allocation3], 1 }
  0xec   :  { %150 = vsyncpa [#allocation6], 1 }
  0xed   :  { %151 = vsyncpa [#allocation4], 1 }

</bundles_post_ra>
